<compile_context>
chip_gen: v7x
topology: tpu7x:2x2x1
jax: 0.10.0
libtpu: 0.0.40
codegen_flags: <defaults>
</compile_context>

<pallas_src>
import math

import jax
import jax.numpy as jnp
from jax.experimental import pallas as pl
from jax.experimental.pallas import tpu as pltpu


def _token_embedding_kernel(ids_ref, pe_ref, emb_hbm, out_ref, rowbuf, sems):
    """Per token tile: DMA-gather TM embedding rows, scale by sqrt(D), add PE tile."""
    TM, D = out_ref.shape
    V = emb_hbm.shape[0]
    base = pl.program_id(0) * TM

    # Issue all TM row DMAs first so they are in flight concurrently, then wait.
    copies = []
    for j in range(TM):  # static unroll; TM is kept small by the wrapper
        # Clamp ids: PyTorch nn.Embedding would raise on out-of-range ids; we avoid
        # an out-of-bounds HBM DMA instead.
        row = jnp.clip(ids_ref[base + j], 0, V - 1)
        cp = pltpu.make_async_copy(
            emb_hbm.at[pl.ds(row, 1), :],   # (1, D) row in HBM
            rowbuf.at[pl.ds(j, 1), :],      # (1, D) slot in VMEM scratch
            sems.at[j],
        )
        cp.start()
        copies.append(cp)
    for cp in copies:
        cp.wait()

    scale = jnp.float32(math.sqrt(D))       # ScaleEmbedding: * sqrt(embedding_dim)
    rows = rowbuf[...].astype(jnp.float32)
    # PositionalEncoding: add sinusoidal table tile (dropout = identity in eval).
    out_ref[...] = (rows * scale + pe_ref[...]).astype(out_ref.dtype)


def sinusoidal_pe(max_len: int, d_model: int) -> jnp.ndarray:
    """Standard sinusoidal positional-encoding buffer (computed once, like register_buffer)."""
    pos = jnp.arange(max_len, dtype=jnp.float32)[:, None]
    div = jnp.exp(jnp.arange(0, d_model, 2, dtype=jnp.float32) * (-math.log(10000.0) / d_model))
    pe = jnp.zeros((max_len, d_model), jnp.float32)
    pe = pe.at[:, 0::2].set(jnp.sin(pos * div))
    pe = pe.at[:, 1::2].set(jnp.cos(pos * div))
    return pe


def _pick_token_tile(seq_len: int) -> int:
    """Largest small multiple-of-8 tile that divides the sequence length."""
    for tm in (64, 32, 16, 8):
        if seq_len % tm == 0:
            return tm
    return seq_len  # tiny / odd sequences: one tile per batch row


def token_embedding(ids: jnp.ndarray, emb_table: jnp.ndarray, pe_full: jnp.ndarray) -> jnp.ndarray:
    """ids: (B, S) int32; emb_table: (V, D); pe_full: (max_len, D). Returns (B, S, D) f32."""
    B, S = ids.shape
    V, D = emb_table.shape
    N = B * S
    TM = _pick_token_tile(S)
    assert S % TM == 0 and N % TM == 0
    seq_tiles = S // TM

    ids_flat = ids.reshape(N).astype(jnp.int32)        # scalar-prefetch arg (SMEM)
    pe_slice = pe_full[:S, :].astype(jnp.float32)      # glue: slice PE buffer to seq length

    grid_spec = pltpu.PrefetchScalarGridSpec(
        num_scalar_prefetch=1,
        grid=(N // TM,),
        in_specs=[
            # PE tile for this token tile's sequence positions (tokens iterate row-major).
            pl.BlockSpec((TM, D), lambda i, ids_sref: (i % seq_tiles, 0)),
            # Embedding table stays in HBM; rows are gathered by manual DMA.
            pl.BlockSpec(memory_space=pl.ANY),
        ],
        out_specs=pl.BlockSpec((TM, D), lambda i, ids_sref: (i, 0)),
        scratch_shapes=[
            pltpu.VMEM((TM, D), emb_table.dtype),   # gathered-row buffer
            pltpu.SemaphoreType.DMA((TM,)),         # one DMA sem per row copy
        ],
    )

    out_flat = pl.pallas_call(
        _token_embedding_kernel,
        out_shape=jax.ShapeDtypeStruct((N, D), jnp.float32),
        grid_spec=grid_spec,
        compiler_params=pltpu.CompilerParams(
            dimension_semantics=("parallel",),      # token tiles are independent → megacore split
        ),
    )(ids_flat, pe_slice, emb_table)

    return out_flat.reshape(B, S, D)


if __name__ == "__main__":
    # Small, deterministic example shapes (D multiple of 128 for lane-dense stores).
    num_vocab = 64
    embedding_dim = 128
    batch, seq = 2, 8
    max_len = 64

    key = jax.random.PRNGKey(0)
    k_ids, k_emb = jax.random.split(key)

    ids = jax.random.randint(k_ids, (batch, seq), 0, num_vocab, dtype=jnp.int32)
    # nn.Embedding default init ~ N(0, 1), deterministic here via PRNGKey(0).
    emb_table = jax.random.normal(k_emb, (num_vocab, embedding_dim), dtype=jnp.float32)
    pe_full = sinusoidal_pe(max_len, embedding_dim)

    out = token_embedding(ids, emb_table, pe_full)
    jax.block_until_ready(out)

    # Pure-JAX reference check.
    ref = emb_table[ids] * jnp.sqrt(jnp.float32(embedding_dim)) + pe_full[:seq][None, :, :]
    assert out.shape == (batch, seq, embedding_dim)
    assert jnp.allclose(out, ref, atol=1e-5), "mismatch vs reference"

    print("KERNEL_OK")
</pallas_src>

<mosaic_0001>
module attributes {stable_mosaic.version = 11 : i64} {
  func.func @_token_embedding_kernel(%arg0: i32, %arg1: memref<16xi32, #tpu.memory_space<smem>>, %arg2: memref<8x128xf32, #tpu.memory_space<vmem>>, %arg3: memref<64x128xf32, #tpu.memory_space<any>>, %arg4: memref<8x128xf32, #tpu.memory_space<vmem>>, %arg5: memref<8x128xf32, #tpu.memory_space<vmem>>, %arg6: memref<8x!tpu.dma_semaphore, #tpu.memory_space<semaphore_mem>>) attributes {dimension_semantics = [#tpu.dimension_semantics<parallel>], iteration_bounds = array<i64: 2>, scalar_prefetch = 1 : i64, scratch_operands = 2 : i64, tpu.core_type = #tpu.core_type<tc>, window_params = [{transform_indices = @transform_0, window_bounds = array<i64: 8, 128>}, {}, {transform_indices = @transform_2, window_bounds = array<i64: 8, 128>}]} {
    %c8_i32 = arith.constant 8 : i32
    %0 = arith.muli %arg0, %c8_i32 : i32
    %c0_i32 = arith.constant 0 : i32
    %1 = arith.addi %0, %c0_i32 : i32
    %2 = arith.index_cast %1 : i32 to index
    %3 = memref.load %arg1[%2] : memref<16xi32, #tpu.memory_space<smem>>
    %c0_i32_0 = arith.constant 0 : i32
    %c63_i32 = arith.constant 63 : i32
    %4 = arith.maxsi %c0_i32_0, %3 : i32
    %5 = arith.minsi %c63_i32, %4 : i32
    %c0_i32_1 = arith.constant 0 : i32
    %c0_i32_2 = arith.constant 0 : i32
    %6 = tpu.memref_slice %arg3[%5, %c0_i32_2] : memref<64x128xf32, #tpu.memory_space<any>> -> memref<1x128xf32, #tpu.memory_space<any>>
    %c0_i32_3 = arith.constant 0 : i32
    %c0_i32_4 = arith.constant 0 : i32
    %7 = tpu.memref_slice %arg5[%c0_i32_3, %c0_i32_4] : memref<8x128xf32, #tpu.memory_space<vmem>> -> memref<1x128xf32, #tpu.memory_space<vmem>>
    %8 = tpu.memref_slice %arg6[%c0_i32_1] : memref<8x!tpu.dma_semaphore, #tpu.memory_space<semaphore_mem>> -> memref<1x!tpu.dma_semaphore, #tpu.memory_space<semaphore_mem>>
    %9 = tpu.memref_squeeze %8 : memref<1x!tpu.dma_semaphore, #tpu.memory_space<semaphore_mem>> -> memref<!tpu.dma_semaphore, #tpu.memory_space<semaphore_mem>>
    tpu.enqueue_dma source(%6 : memref<1x128xf32, #tpu.memory_space<any>>) target(%7 : memref<1x128xf32, #tpu.memory_space<vmem>>) target_semaphore(%9 : memref<!tpu.dma_semaphore, #tpu.memory_space<semaphore_mem>>)
    %c1_i32 = arith.constant 1 : i32
    %10 = arith.addi %0, %c1_i32 : i32
    %11 = arith.index_cast %10 : i32 to index
    %12 = memref.load %arg1[%11] : memref<16xi32, #tpu.memory_space<smem>>
    %c0_i32_5 = arith.constant 0 : i32
    %c63_i32_6 = arith.constant 63 : i32
    %13 = arith.maxsi %c0_i32_5, %12 : i32
    %14 = arith.minsi %c63_i32_6, %13 : i32
    %c1_i32_7 = arith.constant 1 : i32
    %c0_i32_8 = arith.constant 0 : i32
    %15 = tpu.memref_slice %arg3[%14, %c0_i32_8] : memref<64x128xf32, #tpu.memory_space<any>> -> memref<1x128xf32, #tpu.memory_space<any>>
    %c1_i32_9 = arith.constant 1 : i32
    %c0_i32_10 = arith.constant 0 : i32
    %16 = tpu.memref_slice %arg5[%c1_i32_9, %c0_i32_10] : memref<8x128xf32, #tpu.memory_space<vmem>> -> memref<1x128xf32, #tpu.memory_space<vmem>>
    %17 = tpu.memref_slice %arg6[%c1_i32_7] : memref<8x!tpu.dma_semaphore, #tpu.memory_space<semaphore_mem>> -> memref<1x!tpu.dma_semaphore, #tpu.memory_space<semaphore_mem>>
    %18 = tpu.memref_squeeze %17 : memref<1x!tpu.dma_semaphore, #tpu.memory_space<semaphore_mem>> -> memref<!tpu.dma_semaphore, #tpu.memory_space<semaphore_mem>>
    tpu.enqueue_dma source(%15 : memref<1x128xf32, #tpu.memory_space<any>>) target(%16 : memref<1x128xf32, #tpu.memory_space<vmem>>) target_semaphore(%18 : memref<!tpu.dma_semaphore, #tpu.memory_space<semaphore_mem>>)
    %c2_i32 = arith.constant 2 : i32
    %19 = arith.addi %0, %c2_i32 : i32
    %20 = arith.index_cast %19 : i32 to index
    %21 = memref.load %arg1[%20] : memref<16xi32, #tpu.memory_space<smem>>
    %c0_i32_11 = arith.constant 0 : i32
    %c63_i32_12 = arith.constant 63 : i32
    %22 = arith.maxsi %c0_i32_11, %21 : i32
    %23 = arith.minsi %c63_i32_12, %22 : i32
    %c2_i32_13 = arith.constant 2 : i32
    %c0_i32_14 = arith.constant 0 : i32
    %24 = tpu.memref_slice %arg3[%23, %c0_i32_14] : memref<64x128xf32, #tpu.memory_space<any>> -> memref<1x128xf32, #tpu.memory_space<any>>
    %c2_i32_15 = arith.constant 2 : i32
    %c0_i32_16 = arith.constant 0 : i32
    %25 = tpu.memref_slice %arg5[%c2_i32_15, %c0_i32_16] : memref<8x128xf32, #tpu.memory_space<vmem>> -> memref<1x128xf32, #tpu.memory_space<vmem>>
    %26 = tpu.memref_slice %arg6[%c2_i32_13] : memref<8x!tpu.dma_semaphore, #tpu.memory_space<semaphore_mem>> -> memref<1x!tpu.dma_semaphore, #tpu.memory_space<semaphore_mem>>
    %27 = tpu.memref_squeeze %26 : memref<1x!tpu.dma_semaphore, #tpu.memory_space<semaphore_mem>> -> memref<!tpu.dma_semaphore, #tpu.memory_space<semaphore_mem>>
    tpu.enqueue_dma source(%24 : memref<1x128xf32, #tpu.memory_space<any>>) target(%25 : memref<1x128xf32, #tpu.memory_space<vmem>>) target_semaphore(%27 : memref<!tpu.dma_semaphore, #tpu.memory_space<semaphore_mem>>)
    %c3_i32 = arith.constant 3 : i32
    %28 = arith.addi %0, %c3_i32 : i32
    %29 = arith.index_cast %28 : i32 to index
    %30 = memref.load %arg1[%29] : memref<16xi32, #tpu.memory_space<smem>>
    %c0_i32_17 = arith.constant 0 : i32
    %c63_i32_18 = arith.constant 63 : i32
    %31 = arith.maxsi %c0_i32_17, %30 : i32
    %32 = arith.minsi %c63_i32_18, %31 : i32
    %c3_i32_19 = arith.constant 3 : i32
    %c0_i32_20 = arith.constant 0 : i32
    %33 = tpu.memref_slice %arg3[%32, %c0_i32_20] : memref<64x128xf32, #tpu.memory_space<any>> -> memref<1x128xf32, #tpu.memory_space<any>>
    %c3_i32_21 = arith.constant 3 : i32
    %c0_i32_22 = arith.constant 0 : i32
    %34 = tpu.memref_slice %arg5[%c3_i32_21, %c0_i32_22] : memref<8x128xf32, #tpu.memory_space<vmem>> -> memref<1x128xf32, #tpu.memory_space<vmem>>
    %35 = tpu.memref_slice %arg6[%c3_i32_19] : memref<8x!tpu.dma_semaphore, #tpu.memory_space<semaphore_mem>> -> memref<1x!tpu.dma_semaphore, #tpu.memory_space<semaphore_mem>>
    %36 = tpu.memref_squeeze %35 : memref<1x!tpu.dma_semaphore, #tpu.memory_space<semaphore_mem>> -> memref<!tpu.dma_semaphore, #tpu.memory_space<semaphore_mem>>
    tpu.enqueue_dma source(%33 : memref<1x128xf32, #tpu.memory_space<any>>) target(%34 : memref<1x128xf32, #tpu.memory_space<vmem>>) target_semaphore(%36 : memref<!tpu.dma_semaphore, #tpu.memory_space<semaphore_mem>>)
    %c4_i32 = arith.constant 4 : i32
    %37 = arith.addi %0, %c4_i32 : i32
    %38 = arith.index_cast %37 : i32 to index
    %39 = memref.load %arg1[%38] : memref<16xi32, #tpu.memory_space<smem>>
    %c0_i32_23 = arith.constant 0 : i32
    %c63_i32_24 = arith.constant 63 : i32
    %40 = arith.maxsi %c0_i32_23, %39 : i32
    %41 = arith.minsi %c63_i32_24, %40 : i32
    %c4_i32_25 = arith.constant 4 : i32
    %c0_i32_26 = arith.constant 0 : i32
    %42 = tpu.memref_slice %arg3[%41, %c0_i32_26] : memref<64x128xf32, #tpu.memory_space<any>> -> memref<1x128xf32, #tpu.memory_space<any>>
    %c4_i32_27 = arith.constant 4 : i32
    %c0_i32_28 = arith.constant 0 : i32
    %43 = tpu.memref_slice %arg5[%c4_i32_27, %c0_i32_28] : memref<8x128xf32, #tpu.memory_space<vmem>> -> memref<1x128xf32, #tpu.memory_space<vmem>>
    %44 = tpu.memref_slice %arg6[%c4_i32_25] : memref<8x!tpu.dma_semaphore, #tpu.memory_space<semaphore_mem>> -> memref<1x!tpu.dma_semaphore, #tpu.memory_space<semaphore_mem>>
    %45 = tpu.memref_squeeze %44 : memref<1x!tpu.dma_semaphore, #tpu.memory_space<semaphore_mem>> -> memref<!tpu.dma_semaphore, #tpu.memory_space<semaphore_mem>>
    tpu.enqueue_dma source(%42 : memref<1x128xf32, #tpu.memory_space<any>>) target(%43 : memref<1x128xf32, #tpu.memory_space<vmem>>) target_semaphore(%45 : memref<!tpu.dma_semaphore, #tpu.memory_space<semaphore_mem>>)
    %c5_i32 = arith.constant 5 : i32
    %46 = arith.addi %0, %c5_i32 : i32
    %47 = arith.index_cast %46 : i32 to index
    %48 = memref.load %arg1[%47] : memref<16xi32, #tpu.memory_space<smem>>
    %c0_i32_29 = arith.constant 0 : i32
    %c63_i32_30 = arith.constant 63 : i32
    %49 = arith.maxsi %c0_i32_29, %48 : i32
    %50 = arith.minsi %c63_i32_30, %49 : i32
    %c5_i32_31 = arith.constant 5 : i32
    %c0_i32_32 = arith.constant 0 : i32
    %51 = tpu.memref_slice %arg3[%50, %c0_i32_32] : memref<64x128xf32, #tpu.memory_space<any>> -> memref<1x128xf32, #tpu.memory_space<any>>
    %c5_i32_33 = arith.constant 5 : i32
    %c0_i32_34 = arith.constant 0 : i32
    %52 = tpu.memref_slice %arg5[%c5_i32_33, %c0_i32_34] : memref<8x128xf32, #tpu.memory_space<vmem>> -> memref<1x128xf32, #tpu.memory_space<vmem>>
    %53 = tpu.memref_slice %arg6[%c5_i32_31] : memref<8x!tpu.dma_semaphore, #tpu.memory_space<semaphore_mem>> -> memref<1x!tpu.dma_semaphore, #tpu.memory_space<semaphore_mem>>
    %54 = tpu.memref_squeeze %53 : memref<1x!tpu.dma_semaphore, #tpu.memory_space<semaphore_mem>> -> memref<!tpu.dma_semaphore, #tpu.memory_space<semaphore_mem>>
    tpu.enqueue_dma source(%51 : memref<1x128xf32, #tpu.memory_space<any>>) target(%52 : memref<1x128xf32, #tpu.memory_space<vmem>>) target_semaphore(%54 : memref<!tpu.dma_semaphore, #tpu.memory_space<semaphore_mem>>)
    %c6_i32 = arith.constant 6 : i32
    %55 = arith.addi %0, %c6_i32 : i32
    %56 = arith.index_cast %55 : i32 to index
    %57 = memref.load %arg1[%56] : memref<16xi32, #tpu.memory_space<smem>>
    %c0_i32_35 = arith.constant 0 : i32
    %c63_i32_36 = arith.constant 63 : i32
    %58 = arith.maxsi %c0_i32_35, %57 : i32
    %59 = arith.minsi %c63_i32_36, %58 : i32
    %c6_i32_37 = arith.constant 6 : i32
    %c0_i32_38 = arith.constant 0 : i32
    %60 = tpu.memref_slice %arg3[%59, %c0_i32_38] : memref<64x128xf32, #tpu.memory_space<any>> -> memref<1x128xf32, #tpu.memory_space<any>>
    %c6_i32_39 = arith.constant 6 : i32
    %c0_i32_40 = arith.constant 0 : i32
    %61 = tpu.memref_slice %arg5[%c6_i32_39, %c0_i32_40] : memref<8x128xf32, #tpu.memory_space<vmem>> -> memref<1x128xf32, #tpu.memory_space<vmem>>
    %62 = tpu.memref_slice %arg6[%c6_i32_37] : memref<8x!tpu.dma_semaphore, #tpu.memory_space<semaphore_mem>> -> memref<1x!tpu.dma_semaphore, #tpu.memory_space<semaphore_mem>>
    %63 = tpu.memref_squeeze %62 : memref<1x!tpu.dma_semaphore, #tpu.memory_space<semaphore_mem>> -> memref<!tpu.dma_semaphore, #tpu.memory_space<semaphore_mem>>
    tpu.enqueue_dma source(%60 : memref<1x128xf32, #tpu.memory_space<any>>) target(%61 : memref<1x128xf32, #tpu.memory_space<vmem>>) target_semaphore(%63 : memref<!tpu.dma_semaphore, #tpu.memory_space<semaphore_mem>>)
    %c7_i32 = arith.constant 7 : i32
    %64 = arith.addi %0, %c7_i32 : i32
    %65 = arith.index_cast %64 : i32 to index
    %66 = memref.load %arg1[%65] : memref<16xi32, #tpu.memory_space<smem>>
    %c0_i32_41 = arith.constant 0 : i32
    %c63_i32_42 = arith.constant 63 : i32
    %67 = arith.maxsi %c0_i32_41, %66 : i32
    %68 = arith.minsi %c63_i32_42, %67 : i32
    %c7_i32_43 = arith.constant 7 : i32
    %c0_i32_44 = arith.constant 0 : i32
    %69 = tpu.memref_slice %arg3[%68, %c0_i32_44] : memref<64x128xf32, #tpu.memory_space<any>> -> memref<1x128xf32, #tpu.memory_space<any>>
    %c7_i32_45 = arith.constant 7 : i32
    %c0_i32_46 = arith.constant 0 : i32
    %70 = tpu.memref_slice %arg5[%c7_i32_45, %c0_i32_46] : memref<8x128xf32, #tpu.memory_space<vmem>> -> memref<1x128xf32, #tpu.memory_space<vmem>>
    %71 = tpu.memref_slice %arg6[%c7_i32_43] : memref<8x!tpu.dma_semaphore, #tpu.memory_space<semaphore_mem>> -> memref<1x!tpu.dma_semaphore, #tpu.memory_space<semaphore_mem>>
    %72 = tpu.memref_squeeze %71 : memref<1x!tpu.dma_semaphore, #tpu.memory_space<semaphore_mem>> -> memref<!tpu.dma_semaphore, #tpu.memory_space<semaphore_mem>>
    tpu.enqueue_dma source(%69 : memref<1x128xf32, #tpu.memory_space<any>>) target(%70 : memref<1x128xf32, #tpu.memory_space<vmem>>) target_semaphore(%72 : memref<!tpu.dma_semaphore, #tpu.memory_space<semaphore_mem>>)
    %c0_i32_47 = arith.constant 0 : i32
    %c0_i32_48 = arith.constant 0 : i32
    %73 = tpu.memref_slice %arg3[%5, %c0_i32_48] : memref<64x128xf32, #tpu.memory_space<any>> -> memref<1x128xf32, #tpu.memory_space<any>>
    %c0_i32_49 = arith.constant 0 : i32
    %c0_i32_50 = arith.constant 0 : i32
    %74 = tpu.memref_slice %arg5[%c0_i32_49, %c0_i32_50] : memref<8x128xf32, #tpu.memory_space<vmem>> -> memref<1x128xf32, #tpu.memory_space<vmem>>
    %75 = tpu.memref_slice %arg6[%c0_i32_47] : memref<8x!tpu.dma_semaphore, #tpu.memory_space<semaphore_mem>> -> memref<1x!tpu.dma_semaphore, #tpu.memory_space<semaphore_mem>>
    %76 = tpu.memref_squeeze %75 : memref<1x!tpu.dma_semaphore, #tpu.memory_space<semaphore_mem>> -> memref<!tpu.dma_semaphore, #tpu.memory_space<semaphore_mem>>
    tpu.wait_dma2 semaphore(%76 : memref<!tpu.dma_semaphore, #tpu.memory_space<semaphore_mem>>) src(%73 : memref<1x128xf32, #tpu.memory_space<any>>) dst(%74 : memref<1x128xf32, #tpu.memory_space<vmem>>)
    %c1_i32_51 = arith.constant 1 : i32
    %c0_i32_52 = arith.constant 0 : i32
    %77 = tpu.memref_slice %arg3[%14, %c0_i32_52] : memref<64x128xf32, #tpu.memory_space<any>> -> memref<1x128xf32, #tpu.memory_space<any>>
    %c1_i32_53 = arith.constant 1 : i32
    %c0_i32_54 = arith.constant 0 : i32
    %78 = tpu.memref_slice %arg5[%c1_i32_53, %c0_i32_54] : memref<8x128xf32, #tpu.memory_space<vmem>> -> memref<1x128xf32, #tpu.memory_space<vmem>>
    %79 = tpu.memref_slice %arg6[%c1_i32_51] : memref<8x!tpu.dma_semaphore, #tpu.memory_space<semaphore_mem>> -> memref<1x!tpu.dma_semaphore, #tpu.memory_space<semaphore_mem>>
    %80 = tpu.memref_squeeze %79 : memref<1x!tpu.dma_semaphore, #tpu.memory_space<semaphore_mem>> -> memref<!tpu.dma_semaphore, #tpu.memory_space<semaphore_mem>>
    tpu.wait_dma2 semaphore(%80 : memref<!tpu.dma_semaphore, #tpu.memory_space<semaphore_mem>>) src(%77 : memref<1x128xf32, #tpu.memory_space<any>>) dst(%78 : memref<1x128xf32, #tpu.memory_space<vmem>>)
    %c2_i32_55 = arith.constant 2 : i32
    %c0_i32_56 = arith.constant 0 : i32
    %81 = tpu.memref_slice %arg3[%23, %c0_i32_56] : memref<64x128xf32, #tpu.memory_space<any>> -> memref<1x128xf32, #tpu.memory_space<any>>
    %c2_i32_57 = arith.constant 2 : i32
    %c0_i32_58 = arith.constant 0 : i32
    %82 = tpu.memref_slice %arg5[%c2_i32_57, %c0_i32_58] : memref<8x128xf32, #tpu.memory_space<vmem>> -> memref<1x128xf32, #tpu.memory_space<vmem>>
    %83 = tpu.memref_slice %arg6[%c2_i32_55] : memref<8x!tpu.dma_semaphore, #tpu.memory_space<semaphore_mem>> -> memref<1x!tpu.dma_semaphore, #tpu.memory_space<semaphore_mem>>
    %84 = tpu.memref_squeeze %83 : memref<1x!tpu.dma_semaphore, #tpu.memory_space<semaphore_mem>> -> memref<!tpu.dma_semaphore, #tpu.memory_space<semaphore_mem>>
    tpu.wait_dma2 semaphore(%84 : memref<!tpu.dma_semaphore, #tpu.memory_space<semaphore_mem>>) src(%81 : memref<1x128xf32, #tpu.memory_space<any>>) dst(%82 : memref<1x128xf32, #tpu.memory_space<vmem>>)
    %c3_i32_59 = arith.constant 3 : i32
    %c0_i32_60 = arith.constant 0 : i32
    %85 = tpu.memref_slice %arg3[%32, %c0_i32_60] : memref<64x128xf32, #tpu.memory_space<any>> -> memref<1x128xf32, #tpu.memory_space<any>>
    %c3_i32_61 = arith.constant 3 : i32
    %c0_i32_62 = arith.constant 0 : i32
    %86 = tpu.memref_slice %arg5[%c3_i32_61, %c0_i32_62] : memref<8x128xf32, #tpu.memory_space<vmem>> -> memref<1x128xf32, #tpu.memory_space<vmem>>
    %87 = tpu.memref_slice %arg6[%c3_i32_59] : memref<8x!tpu.dma_semaphore, #tpu.memory_space<semaphore_mem>> -> memref<1x!tpu.dma_semaphore, #tpu.memory_space<semaphore_mem>>
    %88 = tpu.memref_squeeze %87 : memref<1x!tpu.dma_semaphore, #tpu.memory_space<semaphore_mem>> -> memref<!tpu.dma_semaphore, #tpu.memory_space<semaphore_mem>>
    tpu.wait_dma2 semaphore(%88 : memref<!tpu.dma_semaphore, #tpu.memory_space<semaphore_mem>>) src(%85 : memref<1x128xf32, #tpu.memory_space<any>>) dst(%86 : memref<1x128xf32, #tpu.memory_space<vmem>>)
    %c4_i32_63 = arith.constant 4 : i32
    %c0_i32_64 = arith.constant 0 : i32
    %89 = tpu.memref_slice %arg3[%41, %c0_i32_64] : memref<64x128xf32, #tpu.memory_space<any>> -> memref<1x128xf32, #tpu.memory_space<any>>
    %c4_i32_65 = arith.constant 4 : i32
    %c0_i32_66 = arith.constant 0 : i32
    %90 = tpu.memref_slice %arg5[%c4_i32_65, %c0_i32_66] : memref<8x128xf32, #tpu.memory_space<vmem>> -> memref<1x128xf32, #tpu.memory_space<vmem>>
    %91 = tpu.memref_slice %arg6[%c4_i32_63] : memref<8x!tpu.dma_semaphore, #tpu.memory_space<semaphore_mem>> -> memref<1x!tpu.dma_semaphore, #tpu.memory_space<semaphore_mem>>
    %92 = tpu.memref_squeeze %91 : memref<1x!tpu.dma_semaphore, #tpu.memory_space<semaphore_mem>> -> memref<!tpu.dma_semaphore, #tpu.memory_space<semaphore_mem>>
    tpu.wait_dma2 semaphore(%92 : memref<!tpu.dma_semaphore, #tpu.memory_space<semaphore_mem>>) src(%89 : memref<1x128xf32, #tpu.memory_space<any>>) dst(%90 : memref<1x128xf32, #tpu.memory_space<vmem>>)
    %c5_i32_67 = arith.constant 5 : i32
    %c0_i32_68 = arith.constant 0 : i32
    %93 = tpu.memref_slice %arg3[%50, %c0_i32_68] : memref<64x128xf32, #tpu.memory_space<any>> -> memref<1x128xf32, #tpu.memory_space<any>>
    %c5_i32_69 = arith.constant 5 : i32
    %c0_i32_70 = arith.constant 0 : i32
    %94 = tpu.memref_slice %arg5[%c5_i32_69, %c0_i32_70] : memref<8x128xf32, #tpu.memory_space<vmem>> -> memref<1x128xf32, #tpu.memory_space<vmem>>
    %95 = tpu.memref_slice %arg6[%c5_i32_67] : memref<8x!tpu.dma_semaphore, #tpu.memory_space<semaphore_mem>> -> memref<1x!tpu.dma_semaphore, #tpu.memory_space<semaphore_mem>>
    %96 = tpu.memref_squeeze %95 : memref<1x!tpu.dma_semaphore, #tpu.memory_space<semaphore_mem>> -> memref<!tpu.dma_semaphore, #tpu.memory_space<semaphore_mem>>
    tpu.wait_dma2 semaphore(%96 : memref<!tpu.dma_semaphore, #tpu.memory_space<semaphore_mem>>) src(%93 : memref<1x128xf32, #tpu.memory_space<any>>) dst(%94 : memref<1x128xf32, #tpu.memory_space<vmem>>)
    %c6_i32_71 = arith.constant 6 : i32
    %c0_i32_72 = arith.constant 0 : i32
    %97 = tpu.memref_slice %arg3[%59, %c0_i32_72] : memref<64x128xf32, #tpu.memory_space<any>> -> memref<1x128xf32, #tpu.memory_space<any>>
    %c6_i32_73 = arith.constant 6 : i32
    %c0_i32_74 = arith.constant 0 : i32
    %98 = tpu.memref_slice %arg5[%c6_i32_73, %c0_i32_74] : memref<8x128xf32, #tpu.memory_space<vmem>> -> memref<1x128xf32, #tpu.memory_space<vmem>>
    %99 = tpu.memref_slice %arg6[%c6_i32_71] : memref<8x!tpu.dma_semaphore, #tpu.memory_space<semaphore_mem>> -> memref<1x!tpu.dma_semaphore, #tpu.memory_space<semaphore_mem>>
    %100 = tpu.memref_squeeze %99 : memref<1x!tpu.dma_semaphore, #tpu.memory_space<semaphore_mem>> -> memref<!tpu.dma_semaphore, #tpu.memory_space<semaphore_mem>>
    tpu.wait_dma2 semaphore(%100 : memref<!tpu.dma_semaphore, #tpu.memory_space<semaphore_mem>>) src(%97 : memref<1x128xf32, #tpu.memory_space<any>>) dst(%98 : memref<1x128xf32, #tpu.memory_space<vmem>>)
    %c7_i32_75 = arith.constant 7 : i32
    %c0_i32_76 = arith.constant 0 : i32
    %101 = tpu.memref_slice %arg3[%68, %c0_i32_76] : memref<64x128xf32, #tpu.memory_space<any>> -> memref<1x128xf32, #tpu.memory_space<any>>
    %c7_i32_77 = arith.constant 7 : i32
    %c0_i32_78 = arith.constant 0 : i32
    %102 = tpu.memref_slice %arg5[%c7_i32_77, %c0_i32_78] : memref<8x128xf32, #tpu.memory_space<vmem>> -> memref<1x128xf32, #tpu.memory_space<vmem>>
    %103 = tpu.memref_slice %arg6[%c7_i32_75] : memref<8x!tpu.dma_semaphore, #tpu.memory_space<semaphore_mem>> -> memref<1x!tpu.dma_semaphore, #tpu.memory_space<semaphore_mem>>
    %104 = tpu.memref_squeeze %103 : memref<1x!tpu.dma_semaphore, #tpu.memory_space<semaphore_mem>> -> memref<!tpu.dma_semaphore, #tpu.memory_space<semaphore_mem>>
    tpu.wait_dma2 semaphore(%104 : memref<!tpu.dma_semaphore, #tpu.memory_space<semaphore_mem>>) src(%101 : memref<1x128xf32, #tpu.memory_space<any>>) dst(%102 : memref<1x128xf32, #tpu.memory_space<vmem>>)
    %c0 = arith.constant 0 : index
    %c0_79 = arith.constant 0 : index
    %105 = vector.load %arg5[%c0, %c0_79] : memref<8x128xf32, #tpu.memory_space<vmem>>, vector<8x128xf32>
    %cst = arith.constant 11.3137083 : f32
    %106 = vector.broadcast %cst : f32 to vector<8x128xf32>
    %107 = arith.mulf %105, %106 : vector<8x128xf32>
    %c0_80 = arith.constant 0 : index
    %c0_81 = arith.constant 0 : index
    %108 = vector.load %arg2[%c0_80, %c0_81] : memref<8x128xf32, #tpu.memory_space<vmem>>, vector<8x128xf32>
    %109 = arith.addf %107, %108 : vector<8x128xf32>
    %c0_82 = arith.constant 0 : index
    %c0_83 = arith.constant 0 : index
    %110 = vector.load %arg4[%c0_82, %c0_83] : memref<8x128xf32, #tpu.memory_space<vmem>>, vector<8x128xf32>
    tpu.vector_store %arg4[%c0_82, %c0_83], %109 {strides = array<i32>} : memref<8x128xf32, #tpu.memory_space<vmem>>, vector<8x128xf32>,
    return
  }
  func.func @transform_0(%arg0: i32, %arg1: memref<16xi32, #tpu.memory_space<smem>>) -> (i32, i32) {
    %c1_i32 = arith.constant 1 : i32
    %c0_i32 = arith.constant 0 : i32
    %0 = arith.cmpi eq, %c1_i32, %c0_i32 : i32
    %c1_i32_0 = arith.constant 1 : i32
    %1 = arith.select %0, %c1_i32_0, %c1_i32 : i32
    %2 = arith.remsi %arg0, %1 : i32
    %c0_i32_1 = arith.constant 0 : i32
    %3 = arith.cmpi ne, %2, %c0_i32_1 : i32
    %c0_i32_2 = arith.constant 0 : i32
    %4 = arith.cmpi slt, %2, %c0_i32_2 : i32
    %c0_i32_3 = arith.constant 0 : i32
    %5 = arith.cmpi slt, %1, %c0_i32_3 : i32
    %6 = arith.xori %4, %5 : i1
    %7 = arith.andi %6, %3 : i1
    %8 = arith.addi %2, %1 : i32
    %9 = arith.select %7, %8, %2 : i32
    %c0_i32_4 = arith.constant 0 : i32
    %c0_i32_5 = arith.constant 0 : i32
    return %9, %c0_i32_4 : i32, i32
  }
  func.func @transform_2(%arg0: i32, %arg1: memref<16xi32, #tpu.memory_space<smem>>) -> (i32, i32) {
    %c0_i32 = arith.constant 0 : i32
    %c0_i32_0 = arith.constant 0 : i32
    return %arg0, %c0_i32 : i32, i32
  }
}

</mosaic_0001>

<bundles_post_ra>
// kernel: tpu_custom_call.1
= control target key start
LH: loop header
LB: loop body
LE: loop exit
PB: predicated region body
PF: predicated region fallthrough
CT: control target
= control target key end

     0   :  { %s1245_s0 = inlined_call_operand.hbm [shape: s32[16], index: 0, kind: input, shape index: {}]   ;;  %s1246_s1 = inlined_call_operand.hbm [shape: f32[8,128], index: 1, kind: input, shape index: {}]   ;;  %s1247_s2 = inlined_call_operand.hbm [shape: f32[64,128], index: 2, kind: input, shape index: {}]   ;;  %s1248_s3 = inlined_call_operand.hbm [shape: f32[16,128], index: 3, kind: output, shape index: {}]  }
   0x1   :  { %1253 = sst [smem:[#allocation40_spill]] %s1246_s1  ;;  %s588_s14 = scalar_lea.hbm %s1245_s0, 16 }
   0x2   :  { %p589_p0 = scmp.ne.s32.totalorder %s1245_s0, %s588_s14  ;;  %p592_p1 = scmp.lt.u32.totalorder %s588_s14, %s1245_s0 }
   0x4   :  { %p594_p2 = pnand %p592_p1, %p589_p0 }
   0x6   :  { %597 = shalt.err (!%p594_p2)  }
   0x7   :  { %s904_s19 = smov [#allocation5]  }
   0x8   :  { %9 = dma.hbm_to_smem %s1245_s0, 16, %s904_s19, [#allocation4] }
   0x9   :  { %862 = dma.done.wait [#allocation4], 16 }
   0xa   :  { %863 = vsyncadd [#allocation4], 4294967280 }
   0xb   :  { %11 = sfence }
   0xc   :  { %12 = vsyncpa [#allocation7], 0 }
   0xd   :  { %13 = vsyncpa [#allocation8], 0 }
   0xe   :  { %15 = vsyncpa [#allocation8 + $0x1], 0  ;;  %s947_s22 = smov 0   ;;  %s949_s23 = smov 0  }
   0xf   :  { %s951_s24 = smov 0   ;;  %s953_s25 = smov 0  }
  0x10 LB: > { %s968_s0 = sadd.s32 4294967295, %s902_s25   ;;  %s446_s26 = sadd.s32 4294967294, %s902_s25   ;;  %s902_s25 = sphi %s953_s25, %s1272_s25   ;;  %s898_s24 = sphi %s951_s24, %s1271_s24   ;;  %s894_s23 = sphi %s949_s23, %s1270_s23   ;;  %s890_s22 = sphi %s947_s22, %s1269_s22  }
  0x11   : > { %s972_s27 = sadd.s32 1, %s902_s25   ;;  %s49_s28 = sadd.s32 1, %s898_s24 }
  0x12   : > { %s46_s29 = ssub.s32 %s902_s25, %s972_s27  ;;  %p59_p3 = scmp.ne.s32.totalorder %s898_s24, %s894_s23 }
  0x13   : > { %p47_p4 = scmp.eq.s32.totalorder %s46_s29, 0  ;;  %p60_p5 = scmp.eq.s32.totalorder %s968_s0, 1 }
  0x14   : > { %p65_p6 = scmp.ne.s32.totalorder %s894_s23, %s890_s22  ;;  %p66_p7 = scmp.eq.s32.totalorder %s446_s26, 1 }
  0x15   : > { %s983_s30 = scalar_select %p47_p4, %s898_s24, %s49_s28  }
  0x16   : > { %p985_p8 = por %p60_p5, %p59_p3  ;;  %p989_p9 = por %p66_p7, %p65_p6 }
  0x17   : > { %1254 = sst [smem:[#allocation39_spill]] %s983_s30  ;;  %p447_p10 = scmp.ge.s32.totalorder %s902_s25, 1 }
  0x18   : > { %s1255_s4 = scalar_select %p985_p8, 1, 0 }
  0x19   : > { %s1256_s5 = scalar_select %p989_p9, 1, 0 }
  0x1a   : > { %p73_p11 = scmp.lt.s32.totalorder %s902_s25, 3  ;;  %p1249_p12 = scmp.eq.s32.totalorder %s968_s0, 0 }
  0x1b   : > { %s905_s7 = smov [#allocation6]   ;;  %s1259_s1 = sld [smem:[#allocation40_spill]] }
  0x1c   : > { %p996_p13 = pnand %p447_p10, %p73_p11  ;;  %s86_s8 = sshll.u32 %s905_s7, 4  ;;  %s87_s8 = int_to_ptr.vmem [resolvable:$true] %s86_s8 }
  0x1e   : > { %s1257_s6 = scalar_select %p996_p13, 1, 0 }
  0x1f   : > { %p535_p0 = pneg %p996_p13 }
  0x21   : > { %p1004_p1 = pnand %p1249_p12, %p535_p0  ;;  %s598_s12 = scalar_lea.hbm %s1259_s1, 128 }
  0x22   : > { %p599_p2 = scmp.ne.s32.totalorder %s1259_s1, %s598_s12  ;;  %p605_p6 = scmp.lt.u32.totalorder %s598_s12, %s1259_s1 }
  0x23   : > { %p600_p3 = pneg %p1004_p1 }
  0x25   : > { %p601_p4 = pnand %p600_p3, %p599_p2 }
  0x27   : > { %p602_p5 = pneg %p601_p4 }
  0x29   : > { %p607_p7 = pnand %p605_p6, %p602_p5 }
  0x2b   : > { %610 = shalt.err (!%p607_p7)
}
  0x2c   : > { %s611_s17 = scalar_lea.vmem %s87_s8, 128  ;;  %p619_p12 = scmp.lt.s32.totalorder %s87_s8, %s87_s8 }
  0x2d   : > { %p612_p10 = scmp.ne.s32.totalorder %s87_s8, %s611_s17  ;;  %p620_p9 = scmp.lt.s32.totalorder %s611_s17, %s611_s17 }
  0x2f   : > { %p614_p11 = pnand %p612_p10, %p600_p3  ;;  %p621_p8 = por %p620_p9, %p619_p12 }
  0x31   : > { %p615_p0 = pneg %p614_p11 }
  0x33   : > { %p622_p13 = pnand %p621_p8, %p615_p0 }
  0x35   : > { %625 = shalt.err (!%p622_p13)
}
  0x36   : > { %538 = dma.hbm_to_vmem [thread:$0]  (!%p1004_p1), %s1259_s1, 128, %s87_s8, [#allocation7]  }
  0x37   : > { %p1260_p2 = scmp.ne.s32.totalorder %s1257_s6, 0 }
  0x38   : > { %p1261_p4 = scmp.eq.s32.totalorder (!%p1260_p2), %s968_s0, 0 }
  0x39   : > { %99 = sbr.rel (%p1260_p2) target bundleno = 316 (0x13c), region = 24 }
  0x40   : > { %865 = dma.done.wait (%p1261_p4), [#allocation7], 128   ;;  %p1262_p3 = pmov %p1261_p4 }
  0x41   : > { %s1252_s20 = sand.u32 1, %s894_s23   ;;  %s1032_s21 = sshll.u32 %s968_s0, 3 }
  0x42   : > { %867 = vsyncadd (%p1262_p3), [#allocation7], 4294967168  ;;  %s1036_s26 = sshll.u32 %s1252_s20, 3  ;;  %s115_s28 = sld [smem:[#allocation5 + %s1032_s21]] }
  0x43   : > { %s906_s29 = smov [#allocation2]   ;;  %s133_s7 = sadd.s32 1, %s1032_s21 }
  0x44   : > { %s129_s6 = sshll.u32 %s906_s29, 4  ;;  %s1042_s8 = sld [smem:[#allocation5 + %s133_s7]]  ;;  %s1040_s6 = int_to_ptr.vmem [resolvable:$true] %s129_s6 }
  0x45   : > { %s154_s9 = sadd.s32 2, %s1032_s21  ;;  %s907_s10 = smov [#allocation2 + $0x1]  }
  0x46   : > { %s150_s11 = sshll.u32 %s907_s10, 4  ;;  %s1045_s12 = sld [smem:[#allocation5 + %s154_s9]]  ;;  %s1047_s11 = int_to_ptr.vmem [resolvable:$true] %s150_s11 }
  0x47   : > { %s1060_s7 = scalar_lea.hbm %s1247_s2, 1024 }
  0x48   : > { %p116_p8 = scmp.gt.s32.totalorder %s115_s28, 0  ;;  %p453_p9 = scmp.lt.s32.totalorder %s115_s28, 63 }
  0x4a   : > { %s1274_s28 = smov (!%p116_p8, %s115_s28), 0  ;;  %p135_p12 = scmp.gt.s32.totalorder %s1042_s8, 0 }
  0x4b   : > { %p459_p13 = scmp.lt.s32.totalorder %s1042_s8, 63  ;;  %s1276_s28 = smov (!%p453_p9, %s1274_s28), 63 }
  0x4c   : > { %s136_s13 = scalar_select %p135_p12, %s1042_s8, 0 }
  0x4d   : > { %s458_s14 = sshll.u32 %s1276_s28, 4  ;;  %p156_p1 = scmp.gt.s32.totalorder %s1045_s12, 0 }
  0x4e   : > { %s121_s17 = scalar_lea.hbm %s1247_s2, %s458_s14 }
  0x4f   : > { %s626_s18 = scalar_lea.hbm %s121_s17, 16  ;;  %p629_p7 = scmp.lt.u32.totalorder %s121_s17, %s1247_s2 }
  0x50   : > { %p627_p6 = scmp.ne.s32.totalorder %s121_s17, %s626_s18  ;;  %p630_p10 = scmp.lt.u32.totalorder %s1060_s7, %s626_s18 }
  0x51   : > { %p632_p0 = scmp.lt.u32.totalorder %s626_s18, %s121_s17 }
  0x52   : > { %p631_p11 = por %p630_p10, %p629_p7 }
  0x54   : > { %p633_p2 = por %p632_p0, %p631_p11 }
  0x56   : > { %p634_p4 = pnand %p633_p2, %p627_p6 }
  0x58   : > { %637 = shalt.err (!%p634_p4)  }
  0x59   : > { %s638_s28 = scalar_lea.vmem %s1040_s6, 16  ;;  %s1069_s14 = scalar_lea.vmem %s1040_s6, 128 }
  0x5a   : > { %p639_p3 = scmp.ne.s32.totalorder %s1040_s6, %s638_s28  ;;  %p643_p8 = scmp.lt.s32.totalorder %s1040_s6, %s1040_s6 }
  0x5b   : > { %p644_p9 = scmp.lt.s32.totalorder %s1069_s14, %s638_s28 }
  0x5d   : > { %p645_p12 = por %p644_p9, %p643_p8 }
  0x5f   : > { %p646_p5 = pnand %p645_p12, %p639_p3 }
  0x61   : > { %649 = shalt.err (!%p646_p5)  }
  0x62   : > { %132 = dma.hbm_to_vmem [thread:$0]  %s121_s17, 16, %s1040_s6, [#allocation3] }
  0x63   : > { %s1278_s13 = smov (!%p459_p13, %s136_s13), 63  ;;  %s908_s18 = smov [#allocation2 + $0x2]  }
  0x64   : > { %s157_s15 = scalar_select %p156_p1, %s1045_s12, 0 }
  0x65   : > { %s464_s16 = sshll.u32 %s1278_s13, 4  ;;  %s171_s19 = sshll.u32 %s908_s18, 4  ;;  %s1083_s19 = int_to_ptr.vmem [resolvable:$true] %s171_s19 }
  0x66   : > { %s140_s10 = scalar_lea.hbm %s1247_s2, %s464_s16 }
  0x67   : > { %s650_s28 = scalar_lea.hbm %s140_s10, 16  ;;  %p653_p6 = scmp.lt.u32.totalorder %s140_s10, %s1247_s2 }
  0x68   : > { %p651_p5 = scmp.ne.s32.totalorder %s140_s10, %s650_s28  ;;  %p654_p7 = scmp.lt.u32.totalorder %s1060_s7, %s650_s28 }
  0x69   : > { %p656_p13 = scmp.lt.u32.totalorder %s650_s28, %s140_s10 }
  0x6a   : > { %p655_p10 = por %p654_p7, %p653_p6 }
  0x6c   : > { %p657_p11 = por %p656_p13, %p655_p10 }
  0x6e   : > { %p658_p1 = pnand %p657_p11, %p651_p5 }
  0x70   : > { %661 = shalt.err (!%p658_p1)  }
  0x71   : > { %s662_s8 = scalar_lea.vmem %s1047_s11, 16  ;;  %p667_p2 = scmp.lt.s32.totalorder %s1047_s11, %s1040_s6 }
  0x72   : > { %p663_p0 = scmp.ne.s32.totalorder %s1047_s11, %s662_s8  ;;  %p668_p4 = scmp.lt.s32.totalorder %s1069_s14, %s662_s8 }
  0x74   : > { %p669_p3 = por %p668_p4, %p667_p2 }
  0x76   : > { %p670_p8 = pnand %p669_p3, %p663_p0 }
  0x78   : > { %673 = shalt.err (!%p670_p8)  }
  0x79   : > { %153 = dma.hbm_to_vmem [thread:$0]  %s140_s10, 16, %s1047_s11, [#allocation3 + $0x1] }
  0x7a   : > { %p1263_p9 = scmp.lt.s32.totalorder %s1045_s12, 63  ;;  %s175_s1 = sadd.s32 3, %s1032_s21 }
  0x7b   : > { %s1098_s13 = sld [smem:[#allocation5 + %s175_s1]] }
  0x7c   : > { %s1280_s15 = smov (!%p1263_p9, %s157_s15), 63 }
  0x7d   : > { %s470_s20 = sshll.u32 %s1280_s15, 4 }
  0x7e   : > { %s161_s18 = scalar_lea.hbm %s1247_s2, %s470_s20 }
  0x7f   : > { %s674_s29 = scalar_lea.hbm %s161_s18, 16  ;;  %p677_p5 = scmp.lt.u32.totalorder %s161_s18, %s1247_s2 }
  0x80   : > { %p675_p12 = scmp.ne.s32.totalorder %s161_s18, %s674_s29  ;;  %p678_p6 = scmp.lt.u32.totalorder %s1060_s7, %s674_s29 }
  0x81   : > { %p680_p10 = scmp.lt.u32.totalorder %s674_s29, %s161_s18 }
  0x82   : > { %p679_p7 = por %p678_p6, %p677_p5 }
  0x84   : > { %p681_p13 = por %p680_p10, %p679_p7 }
  0x86   : > { %p682_p11 = pnand %p681_p13, %p675_p12 }
  0x88   : > { %685 = shalt.err (!%p682_p11)  }
  0x89   : > { %s686_s11 = scalar_lea.vmem %s1083_s19, 16  ;;  %p691_p0 = scmp.lt.s32.totalorder %s1083_s19, %s1040_s6 }
  0x8a   : > { %p687_p1 = scmp.ne.s32.totalorder %s1083_s19, %s686_s11  ;;  %p692_p2 = scmp.lt.s32.totalorder %s1069_s14, %s686_s11 }
  0x8c   : > { %p693_p4 = por %p692_p2, %p691_p0 }
  0x8e   : > { %p694_p3 = pnand %p693_p4, %p687_p1 }
  0x90   : > { %697 = shalt.err (!%p694_p3)  }
  0x91   : > { %174 = dma.hbm_to_vmem [thread:$0]  %s161_s18, 16, %s1083_s19, [#allocation3 + $0x2] }
  0x92   : > { %s909_s12 = smov [#allocation2 + $0x3]   ;;  %s196_s10 = sadd.s32 4, %s1032_s21 }
  0x93   : > { %s192_s15 = sshll.u32 %s909_s12, 4  ;;  %s1114_s8 = sld [smem:[#allocation5 + %s196_s10]]  ;;  %s193_s15 = int_to_ptr.vmem [resolvable:$true] %s192_s15 }
  0x94   : > { %s910_s1 = smov [#allocation2 + $0x4]   ;;  %s217_s17 = sadd.s32 5, %s1032_s21 }
  0x95   : > { %s213_s20 = sshll.u32 %s910_s1, 4  ;;  %p177_p8 = scmp.gt.s32.totalorder %s1098_s13, 0  ;;  %s1122_s20 = int_to_ptr.vmem [resolvable:$true] %s213_s20 }
  0x96   : > { %p471_p9 = scmp.lt.s32.totalorder %s1098_s13, 63  ;;  %s1119_s16 = sld [smem:[#allocation5 + %s217_s17]] }
  0x97   : > { %s1282_s13 = smov (!%p177_p8, %s1098_s13), 0  ;;  %s238_s19 = sadd.s32 6, %s1032_s21 }
  0x98   : > { %s1284_s13 = smov (!%p471_p9, %s1282_s13), 63 }
  0x99   : > { %p198_p12 = scmp.gt.s32.totalorder %s1114_s8, 0  ;;  %s476_s18 = sshll.u32 %s1284_s13, 4 }
  0x9a   : > { %s182_s28 = scalar_lea.hbm %s1247_s2, %s476_s18 }
  0x9b   : > { %s698_s11 = scalar_lea.hbm %s182_s28, 16  ;;  %p701_p10 = scmp.lt.u32.totalorder %s182_s28, %s1247_s2 }
  0x9c   : > { %p219_p6 = scmp.gt.s32.totalorder %s1119_s16, 0  ;;  %p699_p7 = scmp.ne.s32.totalorder %s182_s28, %s698_s11 }
  0x9d   : > { %p702_p13 = scmp.lt.u32.totalorder %s1060_s7, %s698_s11  ;;  %p704_p1 = scmp.lt.u32.totalorder %s698_s11, %s182_s28 }
  0x9f   : > { %p703_p11 = por %p702_p13, %p701_p10 }
  0xa1   : > { %p705_p0 = por %p704_p1, %p703_p11 }
  0xa3   : > { %p706_p2 = pnand %p705_p0, %p699_p7 }
  0xa5   : > { %709 = shalt.err (!%p706_p2)  }
  0xa6   : > { %s710_s1 = scalar_lea.vmem %s193_s15, 16  ;;  %p715_p3 = scmp.lt.s32.totalorder %s193_s15, %s1040_s6 }
  0xa7   : > { %p711_p4 = scmp.ne.s32.totalorder %s193_s15, %s710_s1  ;;  %p716_p8 = scmp.lt.s32.totalorder %s1069_s14, %s710_s1 }
  0xa9   : > { %p717_p9 = por %p716_p8, %p715_p3 }
  0xab   : > { %p718_p5 = pnand %p717_p9, %p711_p4 }
  0xad   : > { %721 = shalt.err (!%p718_p5)  }
  0xae   : > { %195 = dma.hbm_to_vmem [thread:$0]  %s182_s28, 16, %s193_s15, [#allocation3 + $0x3] }
  0xaf   : > { %s199_s13 = scalar_select %p198_p12, %s1114_s8, 0 }
  0xb0   : > { %s220_s17 = scalar_select %p219_p6, %s1119_s16, 0 }
  0xb1   : > { %p1264_p7 = scmp.lt.s32.totalorder %s1114_s8, 63  ;;  %p483_p10 = scmp.lt.s32.totalorder %s1119_s16, 63 }
  0xb2   : > { %s911_s18 = smov [#allocation2 + $0x5]   ;;  %s1146_s11 = sld [smem:[#allocation5 + %s238_s19]] }
  0xb3   : > { %s1286_s13 = smov (!%p1264_p7, %s199_s13), 63  ;;  %s234_s29 = sshll.u32 %s911_s18, 4  ;;  %s235_s29 = int_to_ptr.vmem [resolvable:$true] %s234_s29 }
  0xb4   : > { %s482_s9 = sshll.u32 %s1286_s13, 4 }
  0xb5   : > { %s203_s12 = scalar_lea.hbm %s1247_s2, %s482_s9 }
  0xb6   : > { %s722_s10 = scalar_lea.hbm %s203_s12, 16  ;;  %p725_p12 = scmp.lt.u32.totalorder %s203_s12, %s1247_s2 }
  0xb7   : > { %p723_p5 = scmp.ne.s32.totalorder %s203_s12, %s722_s10  ;;  %p726_p13 = scmp.lt.u32.totalorder %s1060_s7, %s722_s10 }
  0xb8   : > { %p728_p11 = scmp.lt.u32.totalorder %s722_s10, %s203_s12 }
  0xb9   : > { %p727_p6 = por %p726_p13, %p725_p12 }
  0xbb   : > { %p729_p1 = por %p728_p11, %p727_p6 }
  0xbd   : > { %p730_p0 = pnand %p729_p1, %p723_p5 }
  0xbf   : > { %733 = shalt.err (!%p730_p0)  }
  0xc0   : > { %s734_s8 = scalar_lea.vmem %s1122_s20, 16  ;;  %p739_p4 = scmp.lt.s32.totalorder %s1122_s20, %s1040_s6 }
  0xc1   : > { %p735_p2 = scmp.ne.s32.totalorder %s1122_s20, %s734_s8  ;;  %p740_p3 = scmp.lt.s32.totalorder %s1069_s14, %s734_s8 }
  0xc3   : > { %p741_p8 = por %p740_p3, %p739_p4 }
  0xc5   : > { %p742_p9 = pnand %p741_p8, %p735_p2 }
  0xc7   : > { %745 = shalt.err (!%p742_p9)  }
  0xc8   : > { %216 = dma.hbm_to_vmem [thread:$0]  %s203_s12, 16, %s1122_s20, [#allocation3 + $0x4] }
  0xc9   : > { %s1288_s17 = smov (!%p483_p10, %s220_s17), 63  ;;  %s912_s30 = smov [#allocation2 + $0x6]  }
  0xca   : > { %s255_s19 = sshll.u32 %s912_s30, 4  ;;  %s488_s13 = sshll.u32 %s1288_s17, 4  ;;  %s256_s19 = int_to_ptr.vmem [resolvable:$true] %s255_s19 }
  0xcb   : > { %s259_s18 = sadd.s32 7, %s1032_s21  ;;  %s224_s28 = scalar_lea.hbm %s1247_s2, %s488_s13 }
  0xcc   : > { %p240_p7 = scmp.gt.s32.totalorder %s1146_s11, 0  ;;  %s746_s10 = scalar_lea.hbm %s224_s28, 16 }
  0xcd   : > { %p747_p5 = scmp.ne.s32.totalorder %s224_s28, %s746_s10  ;;  %p749_p12 = scmp.lt.u32.totalorder %s224_s28, %s1247_s2 }
  0xce   : > { %p750_p13 = scmp.lt.u32.totalorder %s1060_s7, %s746_s10  ;;  %p752_p11 = scmp.lt.u32.totalorder %s746_s10, %s224_s28 }
  0xd0   : > { %p751_p6 = por %p750_p13, %p749_p12 }
  0xd2   : > { %p753_p10 = por %p752_p11, %p751_p6 }
  0xd4   : > { %p754_p1 = pnand %p753_p10, %p747_p5 }
  0xd6   : > { %757 = shalt.err (!%p754_p1)  }
  0xd7   : > { %s758_s20 = scalar_lea.vmem %s235_s29, 16  ;;  %p763_p2 = scmp.lt.s32.totalorder %s235_s29, %s1040_s6 }
  0xd8   : > { %p759_p0 = scmp.ne.s32.totalorder %s235_s29, %s758_s20  ;;  %p764_p4 = scmp.lt.s32.totalorder %s1069_s14, %s758_s20 }
  0xda   : > { %p765_p3 = por %p764_p4, %p763_p2 }
  0xdc   : > { %p766_p8 = pnand %p765_p3, %p759_p0 }
  0xde   : > { %769 = shalt.err (!%p766_p8)  }
  0xdf   : > { %237 = dma.hbm_to_vmem [thread:$0]  %s224_s28, 16, %s235_s29, [#allocation3 + $0x5] }
  0xe0   : > { %s241_s21 = scalar_select %p240_p7, %s1146_s11, 0 }
  0xe1   : > { %p489_p9 = scmp.lt.s32.totalorder %s1146_s11, 63  ;;  %s260_s16 = sld [smem:[#allocation5 + %s259_s18]] }
  0xe3   : > { %s1290_s21 = smov (!%p489_p9, %s241_s21), 63 }
  0xe4   : > { %s494_s17 = sshll.u32 %s1290_s21, 4 }
  0xe5   : > { %s245_s13 = scalar_lea.hbm %s1247_s2, %s494_s17 }
  0xe6   : > { %s770_s9 = scalar_lea.hbm %s245_s13, 16  ;;  %p773_p12 = scmp.lt.u32.totalorder %s245_s13, %s1247_s2 }
  0xe7   : > { %p771_p5 = scmp.ne.s32.totalorder %s245_s13, %s770_s9  ;;  %p774_p13 = scmp.lt.u32.totalorder %s1060_s7, %s770_s9 }
  0xe8   : > { %p776_p11 = scmp.lt.u32.totalorder %s770_s9, %s245_s13 }
  0xe9   : > { %p775_p6 = por %p774_p13, %p773_p12 }
  0xeb   : > { %p777_p10 = por %p776_p11, %p775_p6 }
  0xed   : > { %p778_p7 = pnand %p777_p10, %p771_p5 }
  0xef   : > { %781 = shalt.err (!%p778_p7)  }
  0xf0   : > { %s782_s29 = scalar_lea.vmem %s256_s19, 16  ;;  %p787_p0 = scmp.lt.s32.totalorder %s256_s19, %s1040_s6 }
  0xf1   : > { %p783_p1 = scmp.ne.s32.totalorder %s256_s19, %s782_s29  ;;  %p788_p2 = scmp.lt.s32.totalorder %s1069_s14, %s782_s29 }
  0xf3   : > { %p789_p4 = por %p788_p2, %p787_p0 }
  0xf5   : > { %p790_p3 = pnand %p789_p4, %p783_p1 }
  0xf7   : > { %793 = shalt.err (!%p790_p3)  }
  0xf8   : > { %258 = dma.hbm_to_vmem [thread:$0]  %s245_s13, 16, %s256_s19, [#allocation3 + $0x6] }
  0xf9   : > { %p261_p8 = scmp.gt.s32.totalorder %s260_s16, 0  ;;  %p495_p9 = scmp.lt.s32.totalorder %s260_s16, 63 }
  0xfa   : > { %s913_s11 = smov [#allocation2 + $0x7]  }
  0xfb   : > { %s276_s18 = sshll.u32 %s913_s11, 4  ;;  %s1292_s16 = smov (!%p261_p8, %s260_s16), 0  ;;  %s277_s18 = int_to_ptr.vmem [resolvable:$true] %s276_s18 }
  0xfc   : > { %s1294_s16 = smov (!%p495_p9, %s1292_s16), 63 }
  0xfd   : > { %s500_s28 = sshll.u32 %s1294_s16, 4 }
  0xfe   : > { %s266_s20 = scalar_lea.hbm %s1247_s2, %s500_s28 }
  0xff   : > { %s794_s21 = scalar_lea.hbm %s266_s20, 16  ;;  %p797_p12 = scmp.lt.u32.totalorder %s266_s20, %s1247_s2 }
 0x100   : > { %p795_p5 = scmp.ne.s32.totalorder %s266_s20, %s794_s21  ;;  %p798_p13 = scmp.lt.u32.totalorder %s1060_s7, %s794_s21 }
 0x101   : > { %p800_p11 = scmp.lt.u32.totalorder %s794_s21, %s266_s20 }
 0x102   : > { %p799_p6 = por %p798_p13, %p797_p12 }
 0x104   : > { %p801_p10 = por %p800_p11, %p799_p6 }
 0x106   : > { %p802_p7 = pnand %p801_p10, %p795_p5 }
 0x108   : > { %805 = shalt.err (!%p802_p7)  }
 0x109   : > { %s806_s19 = scalar_lea.vmem %s277_s18, 16  ;;  %p811_p0 = scmp.lt.s32.totalorder %s277_s18, %s1040_s6 }
 0x10a   : > { %p807_p1 = scmp.ne.s32.totalorder %s277_s18, %s806_s19  ;;  %p812_p2 = scmp.lt.s32.totalorder %s1069_s14, %s806_s19 }
 0x10c   : > { %p813_p4 = por %p812_p2, %p811_p0 }
 0x10e   : > { %p814_p3 = pnand %p813_p4, %p807_p1 }
 0x110   : > { %817 = shalt.err (!%p814_p3)  }
 0x111   : > { %279 = dma.hbm_to_vmem [thread:$0]  %s266_s20, 16, %s277_s18, [#allocation3 + $0x7] }
 0x112   : > { %s113_s16 = scalar_lea.vmem [#allocation9], %s1036_s26 }
 0x113   : > { %868 = dma.done.wait [#allocation3], 16 }
 0x114   : > { %869 = vsyncadd [#allocation3], 4294967280 }
 0x115   : > { %870 = dma.done.wait [#allocation3 + $0x1], 16 }
 0x116   : > { %871 = vsyncadd [#allocation3 + $0x1], 4294967280 }
 0x117   : > { %872 = dma.done.wait [#allocation3 + $0x2], 16 }
 0x118   : > { %873 = vsyncadd [#allocation3 + $0x2], 4294967280 }
 0x119   : > { %874 = dma.done.wait [#allocation3 + $0x3], 16 }
 0x11a   : > { %875 = vsyncadd [#allocation3 + $0x3], 4294967280 }
 0x11b   : > { %876 = dma.done.wait [#allocation3 + $0x4], 16 }
 0x11c   : > { %877 = vsyncadd [#allocation3 + $0x4], 4294967280 }
 0x11d   : > { %878 = dma.done.wait [#allocation3 + $0x5], 16 }
 0x11e   : > { %879 = vsyncadd [#allocation3 + $0x5], 4294967280 }
 0x11f   : > { %880 = dma.done.wait [#allocation3 + $0x6], 16 }
 0x120   : > { %881 = vsyncadd [#allocation3 + $0x6], 4294967280 }
 0x121   : > { %882 = dma.done.wait [#allocation3 + $0x7], 16 }
 0x122   : > { %883 = vsyncadd [#allocation3 + $0x7], 4294967280  ;;  %v297_v0 = vld [vmem:[#allocation2] sm:$0xff]  ;;  %v299_v1 = vld [vmem:[#allocation6] sm:$0xff]  ;;  %s502_s26 = sshll.u32 %s968_s0, 7  ;;  %s316_s6 = sshll.u32 %s113_s16, 4  ;;  %s1203_s6 = int_to_ptr.vmem [resolvable:$true] %s316_s6 }
 0x123   : > { %v298_v2 = vmul.f32 11.313708, %v297_v0  ;;  %s1201_s30 = scalar_lea.hbm %s1248_s3, %s502_s26  ;;  %s1265_s13 = sand.u32 1, %s894_s23  }
 0x124   : > { %s303_s9 = scalar_lea.sflag [#allocation8], %s1265_s13  ;;  %s818_s15 = scalar_lea.vmem %s1203_s6, 128 }
 0x125   : > { %v300_v3 = vadd.f32 %v299_v1, %v298_v2  ;;  %p819_p8 = scmp.ne.s32.totalorder %s1203_s6, %s818_s15  ;;  %p1266_p9 = scmp.ne.s32.totalorder %s1255_s4, 0 }
 0x126   : > { %s914_s0 = smov [#allocation9]  }
 0x127   : > { %301 = vst [vmem:[%s113_s16] sm:$0xff] %v300_v3  ;;  %p820_p5 = pnand %p819_p8, %p1266_p9  ;;  %s822_s10 = sshll.u32 %s914_s0, 4  ;;  %s823_s10 = int_to_ptr.vmem [resolvable:$false] %s822_s10 }
 0x128   : > { %s824_s29 = scalar_lea.vmem %s823_s10, 256  ;;  %p825_p13 = scmp.lt.s32.totalorder %s1203_s6, %s823_s10 }
 0x129   : > { %p821_p12 = pneg %p820_p5  ;;  %p826_p6 = scmp.lt.s32.totalorder %s824_s29, %s818_s15 }
 0x12b   : > { %p827_p11 = por %p826_p6, %p825_p13 }
 0x12d   : > { %p828_p10 = pnand %p827_p11, %p821_p12 }
 0x12f   : > { %831 = shalt.err (!%p828_p10)
}
 0x130   : > { %s832_s11 = scalar_lea.hbm %s1201_s30, 128  ;;  %s836_s1 = scalar_lea.hbm %s1248_s3, 256 }
 0x131   : > { %p833_p7 = scmp.ne.s32.totalorder %s1201_s30, %s832_s11  ;;  %p837_p2 = scmp.lt.u32.totalorder %s1201_s30, %s1248_s3 }
 0x132   : > { %p838_p4 = scmp.lt.u32.totalorder %s836_s1, %s832_s11  ;;  %p840_p8 = scmp.lt.u32.totalorder %s832_s11, %s1201_s30 }
 0x133   : > { %p834_p1 = pnand %p833_p7, %p1266_p9 }
 0x134   : > { %p839_p3 = por %p838_p4, %p837_p2 }
 0x135   : > { %p835_p0 = pneg %p834_p1 }
 0x136   : > { %p841_p5 = por %p840_p8, %p839_p3 }
 0x138   : > { %p842_p12 = pnand %p841_p5, %p835_p0 }
 0x13a   : > { %845 = shalt.err (!%p842_p12)
}
 0x13b   : > { %533 = dma.vmem_to_hbm [thread:$0]  (%p1266_p9), %s1203_s6, 128, %s1201_s30, %s303_s9  }
 0x13c PF: > { %p545_p13 = scmp.ge.s32.totalorder %s902_s25, 2  ;;  %s328_s21 = sand.u32 1, %s890_s22  }
 0x13d   : > { %p1267_p6 = scmp.ne.s32.totalorder %s1256_s5, 0  ;;  %s329_s17 = scalar_lea.sflag [#allocation8], %s328_s21 }
 0x13f   : > { %p540_p11 = pnand %p545_p13, %p1267_p6 }
 0x141   : > { %885 = dma.done.wait (!%p540_p11), %s329_s17, 128  }
 0x142   : > { %887 = vsyncadd (!%p540_p11), %s329_s17, 4294967168  ;;  %s1268_s12 = sld [smem:[#allocation39_spill]]  ;;  %p18_p10 = scmp.ge.s32.totalorder %s972_s27, 4  }
 0x143   : > { %s1269_s22 = smov %s894_s23  ;;  %s1270_s23 = smov %s898_s24 }
 0x144   : > { %s1272_s25 = smov %s972_s27  ;;  %20 = sbr.rel (!%p18_p10) target bundleno = 16 (0x10), region = 122 }
 0x148   : > { %s1271_s24 = smov %s1268_s12 }
 0x14b   :  { %334 = vsyncpa [#allocation7], 1 }
 0x14c   :  { %336 = vsyncpa [#allocation7 + $0x1], 1 }
 0x14d   :  { %337 = vsyncpa [#allocation8], 1 }
 0x14e   :  { %339 = vsyncpa [#allocation8 + $0x1], 1 }
 0x14f   :  { %340 = vsyncmov [#allocation3] }
 0x152   :  { %s341_s25 = vpop.sfrf %340 }
 0x153   :  { %p505_p9 = scmp.ne.s32.totalorder %s341_s25, 0 }
 0x155   :  { %345 = shalt.err (%p505_p9)  }
 0x156   :  { %347 = vsyncmov [#allocation3 + $0x1] }
 0x159   :  { %s348_s4 = vpop.sfrf %347 }
 0x15a   :  { %p506_p7 = scmp.ne.s32.totalorder %s348_s4, 0 }
 0x15c   :  { %352 = shalt.err (%p506_p7)  }
 0x15d   :  { %354 = vsyncmov [#allocation3 + $0x2] }
 0x160   :  { %s355_s5 = vpop.sfrf %354 }
 0x161   :  { %p507_p1 = scmp.ne.s32.totalorder %s355_s5, 0 }
 0x163   :  { %359 = shalt.err (%p507_p1)  }
 0x164   :  { %361 = vsyncmov [#allocation3 + $0x3] }
 0x167   :  { %s362_s19 = vpop.sfrf %361 }
 0x168   :  { %p508_p0 = scmp.ne.s32.totalorder %s362_s19, 0 }
 0x16a   :  { %366 = shalt.err (%p508_p0)  }
 0x16b   :  { %368 = vsyncmov [#allocation3 + $0x4] }
 0x16e   :  { %s369_s2 = vpop.sfrf %368 }
 0x16f   :  { %p509_p2 = scmp.ne.s32.totalorder %s369_s2, 0 }
 0x171   :  { %373 = shalt.err (%p509_p2)  }
 0x172   :  { %375 = vsyncmov [#allocation3 + $0x5] }
 0x175   :  { %s376_s3 = vpop.sfrf %375 }
 0x176   :  { %p510_p4 = scmp.ne.s32.totalorder %s376_s3, 0 }
 0x178   :  { %380 = shalt.err (%p510_p4)  }
 0x179   :  { %382 = vsyncmov [#allocation3 + $0x6] }
 0x17c   :  { %s383_s22 = vpop.sfrf %382 }
 0x17d   :  { %p511_p3 = scmp.ne.s32.totalorder %s383_s22, 0 }
 0x17f   :  { %387 = shalt.err (%p511_p3)  }
 0x180   :  { %389 = vsyncmov [#allocation3 + $0x7] }
 0x183   :  { %s390_s23 = vpop.sfrf %389 }
 0x184   :  { %p512_p8 = scmp.ne.s32.totalorder %s390_s23, 0 }
 0x186   :  { %394 = shalt.err (%p512_p8)  }

</bundles_post_ra>
